<compile_context>
chip_gen: v6e
topology: v6e:2x2x1
jax: 0.10.0
libtpu: 0.0.40
codegen_flags: <defaults>
</compile_context>

<pallas_src>
import jax
import jax.numpy as jnp
from jax import lax
from jax.experimental import pallas as pl
from jax.experimental.pallas import tpu as pltpu


def _i32(v):
    """Python int (possibly >= 2**31) -> wrapped int32 constant."""
    v &= 0xFFFFFFFF
    if v >= 1 << 31:
        v -= 1 << 32
    return jnp.int32(v)


# murmur3 fmix32 constants + stream salts.
_C1 = 0x85EBCA6B
_C2 = 0xC2B2AE35
_GOLDEN = 0x9E3779B9
_SALT1 = 0x1B873593
_SALT2 = 0xCC9E2D51


def _mix32(x):
    """murmur3 finalizer: bijective avalanche mix on int32 (VPU bitwise/mul)."""
    x = x ^ lax.shift_right_logical(x, 16)
    x = x * _i32(_C1)
    x = x ^ lax.shift_right_logical(x, 13)
    x = x * _i32(_C2)
    x = x ^ lax.shift_right_logical(x, 16)
    return x


def _bits_to_unit_float(bits):
    """int32 random bits -> float32 uniform in [1, 2) via mantissa bit-trick."""
    mant = lax.shift_right_logical(bits, 9)            # 23 random mantissa bits
    return lax.bitcast_convert_type(mant | _i32(0x3F800000), jnp.float32)


def _randn_kernel(seed_ref, o_ref):
    tm, tn = o_ref.shape            # static tile shape; tn % 128 == 0, tm even
    half = tm // 2
    pid = pl.program_id(0)
    seed = seed_ref[0]

    # Unique 32-bit counter per (u1, u2) pair across the whole output slab.
    row = lax.broadcasted_iota(jnp.int32, (half, tn), 0)
    col = lax.broadcasted_iota(jnp.int32, (half, tn), 1)
    idx = (pid * half + row) * tn + col
    base = idx * 2 + seed * _i32(_GOLDEN)

    # Two decorrelated uniform bit streams (double-mixed, different salts).
    h1 = _mix32(_mix32(base) ^ _i32(_SALT1))
    h2 = _mix32(_mix32(base + 1) ^ _i32(_SALT2))

    u1 = 2.0 - _bits_to_unit_float(h1)                 # (0, 1]  (log-safe)
    u2 = _bits_to_unit_float(h2) - 1.0                 # [0, 1)

    # Box-Muller, both branches: one uniform pair -> two independent normals.
    r = jnp.sqrt(-2.0 * jnp.log(u1))
    theta = jnp.float32(2.0 * jnp.pi) * u2
    o_ref[:half, :] = (r * jnp.cos(theta)).astype(o_ref.dtype)
    o_ref[half:, :] = (r * jnp.sin(theta)).astype(o_ref.dtype)


def _round_up(x, m):
    return ((x + m - 1) // m) * m


def uniform_random_forward(x, n_out, seed=0):
    """Pallas equivalent of UniformRandom(n_out).forward(x)."""
    batch = int(x.shape[0])
    total = batch * int(n_out)

    cols = 128                                         # lane-dense last dim
    rows_needed = max(1, -(-total // cols))
    tile_rows = min(1024, _round_up(rows_needed, 8))   # even, (8,128)-aligned
    rows = _round_up(rows_needed, tile_rows)
    grid = (rows // tile_rows,)

    seed_arr = jnp.array([seed], dtype=jnp.int32)

    slab = pl.pallas_call(
        _randn_kernel,
        out_shape=jax.ShapeDtypeStruct((rows, cols), jnp.float32),
        grid_spec=pltpu.PrefetchScalarGridSpec(
            num_scalar_prefetch=1,                     # seed lives in SMEM
            grid=grid,
            in_specs=[],
            out_specs=pl.BlockSpec((tile_rows, cols),
                                   lambda i, seed_ref: (i, 0)),
        ),
        compiler_params=pltpu.CompilerParams(
            dimension_semantics=("parallel",)),
    )(seed_arr)

    return slab.reshape(-1)[:total].reshape(batch, n_out)


if __name__ == "__main__":
    # Deterministic example input (values are ignored by the module; only the
    # batch size matters).  NCHW: (B=2, C=4, H=16, W=16).
    key = jax.random.PRNGKey(0)
    x = jax.random.normal(key, (2, 4, 16, 16), dtype=jnp.float32)

    n_out = 32
    y = uniform_random_forward(x, n_out, seed=0)
    y = jax.block_until_ready(y)

    assert y.shape == (x.shape[0], n_out), y.shape
    assert y.dtype == jnp.float32, y.dtype
    assert bool(jnp.all(jnp.isfinite(y))), "non-finite samples"

    # Loose distribution sanity checks (64 samples of N(0, 1)).
    mean = float(jnp.mean(y))
    std = float(jnp.std(y))
    assert abs(mean) < 0.9, f"mean looks off: {mean}"
    assert 0.4 < std < 1.8, f"std looks off: {std}"

    print("KERNEL_OK")
</pallas_src>

<mosaic_0001>
module attributes {stable_mosaic.version = 11 : i64} {
  func.func @_randn_kernel(%arg0: i32, %arg1: memref<1xi32, #tpu.memory_space<smem>>, %arg2: memref<8x128xf32, #tpu.memory_space<vmem>>) attributes {dimension_semantics = [#tpu.dimension_semantics<parallel>], iteration_bounds = array<i64: 1>, scalar_prefetch = 1 : i64, scratch_operands = 0 : i64, tpu.core_type = #tpu.core_type<tc>, window_params = [{transform_indices = @transform_0, window_bounds = array<i64: 8, 128>}]} {
    %c0 = arith.constant 0 : index
    %0 = memref.load %arg1[%c0] : memref<1xi32, #tpu.memory_space<smem>>
    %1 = tpu.iota {dimensions = array<i32: 0>} : vector<4x128xi32>
    %2 = tpu.iota {dimensions = array<i32: 1>} : vector<4x128xi32>
    %c4_i32 = arith.constant 4 : i32
    %3 = arith.muli %arg0, %c4_i32 : i32
    %4 = vector.broadcast %3 : i32 to vector<4x128xi32>
    %5 = arith.addi %4, %1 : vector<4x128xi32>
    %c128_i32 = arith.constant 128 : i32
    %6 = vector.broadcast %c128_i32 : i32 to vector<4x128xi32>
    %7 = arith.muli %5, %6 : vector<4x128xi32>
    %8 = arith.addi %7, %2 : vector<4x128xi32>
    %c2_i32 = arith.constant 2 : i32
    %9 = vector.broadcast %c2_i32 : i32 to vector<4x128xi32>
    %10 = arith.muli %8, %9 : vector<4x128xi32>
    %c-1640531527_i32 = arith.constant -1640531527 : i32
    %11 = arith.muli %0, %c-1640531527_i32 : i32
    %12 = vector.broadcast %11 : i32 to vector<4x128xi32>
    %13 = arith.addi %10, %12 : vector<4x128xi32>
    %c16_i32 = arith.constant 16 : i32
    %14 = vector.broadcast %c16_i32 : i32 to vector<4x128xi32>
    %15 = arith.shrui %13, %14 : vector<4x128xi32>
    %16 = arith.xori %13, %15 : vector<4x128xi32>
    %c-2048144789_i32 = arith.constant -2048144789 : i32
    %17 = vector.broadcast %c-2048144789_i32 : i32 to vector<4x128xi32>
    %18 = arith.muli %16, %17 : vector<4x128xi32>
    %c13_i32 = arith.constant 13 : i32
    %19 = vector.broadcast %c13_i32 : i32 to vector<4x128xi32>
    %20 = arith.shrui %18, %19 : vector<4x128xi32>
    %21 = arith.xori %18, %20 : vector<4x128xi32>
    %c-1028477387_i32 = arith.constant -1028477387 : i32
    %22 = vector.broadcast %c-1028477387_i32 : i32 to vector<4x128xi32>
    %23 = arith.muli %21, %22 : vector<4x128xi32>
    %c16_i32_0 = arith.constant 16 : i32
    %24 = vector.broadcast %c16_i32_0 : i32 to vector<4x128xi32>
    %25 = arith.shrui %23, %24 : vector<4x128xi32>
    %26 = arith.xori %23, %25 : vector<4x128xi32>
    %c461845907_i32 = arith.constant 461845907 : i32
    %27 = vector.broadcast %c461845907_i32 : i32 to vector<4x128xi32>
    %28 = arith.xori %26, %27 : vector<4x128xi32>
    %c16_i32_1 = arith.constant 16 : i32
    %29 = vector.broadcast %c16_i32_1 : i32 to vector<4x128xi32>
    %30 = arith.shrui %28, %29 : vector<4x128xi32>
    %31 = arith.xori %28, %30 : vector<4x128xi32>
    %c-2048144789_i32_2 = arith.constant -2048144789 : i32
    %32 = vector.broadcast %c-2048144789_i32_2 : i32 to vector<4x128xi32>
    %33 = arith.muli %31, %32 : vector<4x128xi32>
    %c13_i32_3 = arith.constant 13 : i32
    %34 = vector.broadcast %c13_i32_3 : i32 to vector<4x128xi32>
    %35 = arith.shrui %33, %34 : vector<4x128xi32>
    %36 = arith.xori %33, %35 : vector<4x128xi32>
    %c-1028477387_i32_4 = arith.constant -1028477387 : i32
    %37 = vector.broadcast %c-1028477387_i32_4 : i32 to vector<4x128xi32>
    %38 = arith.muli %36, %37 : vector<4x128xi32>
    %c16_i32_5 = arith.constant 16 : i32
    %39 = vector.broadcast %c16_i32_5 : i32 to vector<4x128xi32>
    %40 = arith.shrui %38, %39 : vector<4x128xi32>
    %41 = arith.xori %38, %40 : vector<4x128xi32>
    %c1_i32 = arith.constant 1 : i32
    %42 = vector.broadcast %c1_i32 : i32 to vector<4x128xi32>
    %43 = arith.addi %13, %42 : vector<4x128xi32>
    %c16_i32_6 = arith.constant 16 : i32
    %44 = vector.broadcast %c16_i32_6 : i32 to vector<4x128xi32>
    %45 = arith.shrui %43, %44 : vector<4x128xi32>
    %46 = arith.xori %43, %45 : vector<4x128xi32>
    %c-2048144789_i32_7 = arith.constant -2048144789 : i32
    %47 = vector.broadcast %c-2048144789_i32_7 : i32 to vector<4x128xi32>
    %48 = arith.muli %46, %47 : vector<4x128xi32>
    %c13_i32_8 = arith.constant 13 : i32
    %49 = vector.broadcast %c13_i32_8 : i32 to vector<4x128xi32>
    %50 = arith.shrui %48, %49 : vector<4x128xi32>
    %51 = arith.xori %48, %50 : vector<4x128xi32>
    %c-1028477387_i32_9 = arith.constant -1028477387 : i32
    %52 = vector.broadcast %c-1028477387_i32_9 : i32 to vector<4x128xi32>
    %53 = arith.muli %51, %52 : vector<4x128xi32>
    %c16_i32_10 = arith.constant 16 : i32
    %54 = vector.broadcast %c16_i32_10 : i32 to vector<4x128xi32>
    %55 = arith.shrui %53, %54 : vector<4x128xi32>
    %56 = arith.xori %53, %55 : vector<4x128xi32>
    %c-862048943_i32 = arith.constant -862048943 : i32
    %57 = vector.broadcast %c-862048943_i32 : i32 to vector<4x128xi32>
    %58 = arith.xori %56, %57 : vector<4x128xi32>
    %c16_i32_11 = arith.constant 16 : i32
    %59 = vector.broadcast %c16_i32_11 : i32 to vector<4x128xi32>
    %60 = arith.shrui %58, %59 : vector<4x128xi32>
    %61 = arith.xori %58, %60 : vector<4x128xi32>
    %c-2048144789_i32_12 = arith.constant -2048144789 : i32
    %62 = vector.broadcast %c-2048144789_i32_12 : i32 to vector<4x128xi32>
    %63 = arith.muli %61, %62 : vector<4x128xi32>
    %c13_i32_13 = arith.constant 13 : i32
    %64 = vector.broadcast %c13_i32_13 : i32 to vector<4x128xi32>
    %65 = arith.shrui %63, %64 : vector<4x128xi32>
    %66 = arith.xori %63, %65 : vector<4x128xi32>
    %c-1028477387_i32_14 = arith.constant -1028477387 : i32
    %67 = vector.broadcast %c-1028477387_i32_14 : i32 to vector<4x128xi32>
    %68 = arith.muli %66, %67 : vector<4x128xi32>
    %c16_i32_15 = arith.constant 16 : i32
    %69 = vector.broadcast %c16_i32_15 : i32 to vector<4x128xi32>
    %70 = arith.shrui %68, %69 : vector<4x128xi32>
    %71 = arith.xori %68, %70 : vector<4x128xi32>
    %c9_i32 = arith.constant 9 : i32
    %72 = vector.broadcast %c9_i32 : i32 to vector<4x128xi32>
    %73 = arith.shrui %41, %72 : vector<4x128xi32>
    %c1065353216_i32 = arith.constant 1065353216 : i32
    %74 = vector.broadcast %c1065353216_i32 : i32 to vector<4x128xi32>
    %75 = arith.ori %73, %74 : vector<4x128xi32>
    %76 = tpu.bitcast %75 : vector<4x128xi32> -> vector<4x128xf32>
    %cst = arith.constant 2.000000e+00 : f32
    %77 = vector.broadcast %cst : f32 to vector<4x128xf32>
    %78 = arith.subf %77, %76 : vector<4x128xf32>
    %c9_i32_16 = arith.constant 9 : i32
    %79 = vector.broadcast %c9_i32_16 : i32 to vector<4x128xi32>
    %80 = arith.shrui %71, %79 : vector<4x128xi32>
    %c1065353216_i32_17 = arith.constant 1065353216 : i32
    %81 = vector.broadcast %c1065353216_i32_17 : i32 to vector<4x128xi32>
    %82 = arith.ori %80, %81 : vector<4x128xi32>
    %83 = tpu.bitcast %82 : vector<4x128xi32> -> vector<4x128xf32>
    %cst_18 = arith.constant 1.000000e+00 : f32
    %84 = vector.broadcast %cst_18 : f32 to vector<4x128xf32>
    %85 = arith.subf %83, %84 : vector<4x128xf32>
    %86 = math.log %78 : vector<4x128xf32>
    %cst_19 = arith.constant -2.000000e+00 : f32
    %87 = vector.broadcast %cst_19 : f32 to vector<4x128xf32>
    %88 = arith.mulf %87, %86 : vector<4x128xf32>
    %89 = math.sqrt %88 : vector<4x128xf32>
    %cst_20 = arith.constant 6.28318548 : f32
    %90 = vector.broadcast %cst_20 : f32 to vector<4x128xf32>
    %91 = arith.mulf %90, %85 : vector<4x128xf32>
    %92 = math.cos %91 : vector<4x128xf32>
    %93 = arith.mulf %89, %92 : vector<4x128xf32>
    %c0_21 = arith.constant 0 : index
    %c0_22 = arith.constant 0 : index
    %94 = vector.load %arg2[%c0_21, %c0_22] : memref<8x128xf32, #tpu.memory_space<vmem>>, vector<4x128xf32>
    tpu.vector_store %arg2[%c0_21, %c0_22], %93 {strides = array<i32>} : memref<8x128xf32, #tpu.memory_space<vmem>>, vector<4x128xf32>,
    %95 = math.sin %91 : vector<4x128xf32>
    %96 = arith.mulf %89, %95 : vector<4x128xf32>
    %c4 = arith.constant 4 : index
    %c0_23 = arith.constant 0 : index
    %97 = vector.load %arg2[%c4, %c0_23] : memref<8x128xf32, #tpu.memory_space<vmem>>, vector<4x128xf32>
    tpu.vector_store %arg2[%c4, %c0_23], %96 {strides = array<i32>} : memref<8x128xf32, #tpu.memory_space<vmem>>, vector<4x128xf32>,
    return
  }
  func.func @transform_0(%arg0: i32, %arg1: memref<1xi32, #tpu.memory_space<smem>>) -> (i32, i32) {
    %c0_i32 = arith.constant 0 : i32
    %c0_i32_0 = arith.constant 0 : i32
    return %arg0, %c0_i32 : i32, i32
  }
}

</mosaic_0001>

<bundles_post_ra>
// kernel: tpu_custom_call.1
= control target key start
LH: loop header
LB: loop body
LE: loop exit
PB: predicated region body
PF: predicated region fallthrough
CT: control target
= control target key end

     0   :  { %v9_v0 = vlaneseq  ;;  %s395_s0 = inlined_call_operand.<no memory space> [shape: s32[1], index: 0, kind: input, shape index: {}]   ;;  %s396_s1 = inlined_call_operand.hbm [shape: f32[8,128], index: 1, kind: output, shape index: {}]  }
   0x2   :  { %v10_v1 = vshrl.u32 %v9_v0, 7  ;;  %v12_v2 = vand.u32 127, %v9_v0 }
   0x3   :  { %7 = vsyncpa [#allocation5], 0  ;;  %s19_s8 = smul.u32 2654435769, %s395_s0  ;;  %v351_v56 = vmov 683565275  }
   0x4   :  { %v16_v3 = vmul.u32 128, %v10_v1  ;;  %v352_v58 = vmov 2475754826   ;;  %v353_v60 = vmov 2131351028   ;;  %s357_s0 = smov [#allocation4]  }
   0x5   :  { %v20_v5 = vstv %s19_s8  ;;  %v354_v63 = vmov 2102212464   ;;  %v355_v1 = vmov 920167782   ;;  %s293_s9 = sshll.u32 %s357_s0, 4  ;;  %s294_s9 = int_to_ptr.vmem [resolvable:$true] %s293_s9 }
   0x6   :  { %v17_v4 = vadd.s32 %v16_v3, %v12_v2  ;;  %s329_s10 = scalar_lea.vmem %s294_s9, 128  ;;  %p334_p1 = scmp.lt.s32.totalorder %s294_s9, %s294_s9 }
   0x7   :  { %p330_p0 = scmp.ne.s32.totalorder %s294_s9, %s329_s10  ;;  %p335_p2 = scmp.lt.s32.totalorder %s329_s10, %s329_s10 }
   0x8   :  { %v18_v6 = vmul.u32 2, %v17_v4 }
   0x9   :  { %p336_p3 = por %p335_p2, %p334_p1 }
   0xa   :  { %v21_v7 = vadd.s32 %v20_v5, %v18_v6 }
   0xb   :  { %p337_p4 = pnand %p336_p3, %p330_p0 }
   0xc   :  { %v22_v8 = vshrl.u32 %v21_v7, 16  ;;  %v39_v9 = vadd.s32 1, %v21_v7 }
   0xe   :  { %v23_v10 = vxor.u32 %v22_v8, %v21_v7  ;;  %v40_v11 = vshrl.u32 %v39_v9, 16  ;;  %v356_v8 = vmov 1326507024  }
  0x10   :  { %v41_v12 = vxor.u32 %v40_v11, %v39_v9  ;;  %v24_v13 = vmul.u32 2246822507, %v23_v10 }
  0x12   :  { %v42_v14 = vmul.u32 2246822507, %v41_v12  ;;  %v25_v16 = vshrl.u32 %v24_v13, 13 }
  0x14   :  { %v43_v15 = vshrl.u32 %v42_v14, 13  ;;  %v26_v19 = vxor.u32 %v25_v16, %v24_v13 }
  0x16   :  { %v44_v17 = vxor.u32 %v43_v15, %v42_v14  ;;  %v27_v22 = vmul.u32 3266489909, %v26_v19 }
  0x18   :  { %v45_v18 = vmul.u32 3266489909, %v44_v17  ;;  %v28_v25 = vshrl.u32 %v27_v22, 16 }
  0x1a   :  { %v46_v20 = vshrl.u32 %v45_v18, 16  ;;  %v29_v28 = vxor.u32 %v28_v25, %v27_v22 }
  0x1c   :  { %v47_v21 = vxor.u32 %v46_v20, %v45_v18  ;;  %v30_v31 = vxor.u32 461845907, %v29_v28 }
  0x1e   :  { %v48_v23 = vxor.u32 3432918353, %v47_v21  ;;  %v31_v34 = vshrl.u32 %v30_v31, 16 }
  0x20   :  { %v49_v24 = vshrl.u32 %v48_v23, 16  ;;  %v32_v37 = vxor.u32 %v31_v34, %v30_v31 }
  0x22   :  { %v50_v26 = vxor.u32 %v49_v24, %v48_v23  ;;  %v33_v40 = vmul.u32 2246822507, %v32_v37 }
  0x24   :  { %v51_v27 = vmul.u32 2246822507, %v50_v26  ;;  %v34_v43 = vshrl.u32 %v33_v40, 13 }
  0x26   :  { %v52_v29 = vshrl.u32 %v51_v27, 13  ;;  %v35_v47 = vxor.u32 %v34_v43, %v33_v40 }
  0x28   :  { %v53_v30 = vxor.u32 %v52_v29, %v51_v27  ;;  %v36_v51 = vmul.u32 3266489909, %v35_v47 }
  0x2a   :  { %v54_v32 = vmul.u32 3266489909, %v53_v30  ;;  %v37_v62 = vshrl.u32 %v36_v51, 16 }
  0x2c   :  { %v55_v33 = vshrl.u32 %v54_v32, 16  ;;  %v38_v20 = vxor.u32 %v37_v62, %v36_v51 }
  0x2e   :  { %v56_v35 = vxor.u32 %v55_v33, %v54_v32  ;;  %v57_v33 = vshrl.u32 %v38_v20, 9 }
  0x30   :  { %v61_v36 = vshrl.u32 %v56_v35, 9 }
  0x32   :  { %v62_v38 = vor.u32 1065353216, %v61_v36  ;;  %v58_v36 = vor.u32 1065353216, %v57_v33 }
  0x34   :  { %v301_v39 = vadd.f32 -1.0, %v62_v38 }
  0x36   :  { %v371_v41 = vmul.f32 6.2831855, %v301_v39  ;;  %v60_v39 = vsub.f32 2.0, %v58_v36 }
  0x38   :  { %v79_v42 = vand.u32 2139095040, %v371_v41  ;;  %v76_v45 = vand.u32 2147483647, %v371_v41  ;;  %321 = vlog2.f32 %v60_v39  ;;  %vm78_vm7 = vcmp.lt.s32.totalorder %v371_v41, 0 }
  0x3a   :  { %v80_v44 = vshrl.u32 %v79_v42, 23  ;;  %v83_v49 = vand.u32 8388607, %v76_v45  ;;  %vm77_vm8 = vcmp.le.f32.partialorder %v76_v45, 0.7853982 }
  0x3c   :  { %v302_v46 = vadd.s32 4294967169, %v80_v44  ;;  %v84_v53 = vor.u32 8388608, %v83_v49 }
  0x3e   :  { %v86_v48 = vadd.s32 1, %v302_v46  ;;  %v124_v10 = vshll.u32 %v84_v53, 8 }
  0x40   :  { %vm87_vm0 = vcmp.gt.s32.totalorder %v86_v48, 0 }
  0x41   :  { %v88_v50 = vsel %vm87_vm0, %v86_v48, 0 }
  0x42   :  { %v90_v52 = vand.u32 31, %v88_v50  ;;  %v89_v54 = vshrl.u32 %v88_v50, 5 }
  0x44   :  { %v91_v55 = vsub.s32 32, %v90_v52  ;;  %v93_v57 = vshll.u32 %v351_v56, %v90_v52  ;;  %v96_v59 = vshll.u32 %v352_v58, %v90_v52  ;;  %v99_v61 = vshll.u32 %v353_v60, %v90_v52 }
  0x45   :  { %v102_v0 = vshll.u32 %v354_v63, %v90_v52  ;;  %v105_v2 = vshll.u32 %v355_v1, %v90_v52  ;;  %vm108_vm1 = vcmp.lt.s32.totalorder %v89_v54, 1  ;;  %vm111_vm2 = vcmp.lt.s32.totalorder %v89_v54, 4  ;;  %v322_v51 = vpop.eup %321 }
  0x46   :  { %v92_v3 = vshrl.u32 %v351_v56, %v91_v55  ;;  %v94_v4 = vshrl.u32 %v352_v58, %v91_v55  ;;  %v97_v5 = vshrl.u32 %v353_v60, %v91_v55  ;;  %v100_v6 = vshrl.u32 %v354_v63, %v91_v55 }
  0x47   :  { %v103_v7 = vshrl.u32 %v355_v1, %v91_v55  ;;  %v106_v9 = vshrl.u32 %v356_v8, %v91_v55  ;;  %vm109_vm3 = vcmp.lt.s32.totalorder %v89_v54, 2  ;;  %vm110_vm4 = vcmp.lt.s32.totalorder %v89_v54, 3 }
  0x48   :  { %v95_v11 = vor.u32 %v94_v4, %v93_v57  ;;  %v98_v12 = vor.u32 %v97_v5, %v96_v59  ;;  %v101_v13 = vor.u32 %v100_v6, %v99_v61  ;;  %v66_v56 = vmul.f32 0.6931472, %v322_v51 }
  0x49   :  { %v104_v14 = vor.u32 %v103_v7, %v102_v0  ;;  %v107_v15 = vor.u32 %v106_v9, %v105_v2 }
  0x4a   :  { %v112_v16 = vsel %vm108_vm1, %v92_v3, %v95_v11  ;;  %v113_v17 = vsel %vm111_vm2, %v101_v13, 2102212464  ;;  %v116_v18 = vsel %vm108_vm1, %v95_v11, %v98_v12  ;;  %v120_v19 = vsel %vm108_vm1, %v98_v12, %v101_v13 }
  0x4b   :  { %v114_v21 = vsel %vm110_vm4, %v98_v12, %v113_v17  ;;  %v117_v22 = vsel %vm111_vm2, %v104_v14, 920167782  ;;  %v121_v23 = vsel %vm111_vm2, %v107_v15, 1326507024  ;;  %v67_v61 = vmul.f32 -2.0, %v66_v56 }
  0x4c   :  { %v118_v24 = vsel %vm110_vm4, %v101_v13, %v117_v22  ;;  %v122_v25 = vsel %vm110_vm4, %v104_v14, %v121_v23  ;;  %v115_v26 = vsel %vm109_vm3, %v112_v16, %v114_v21  ;;  %vm168_vm1 = vweird.f32 %v371_v41 }
  0x4d   :  { %v119_v27 = vsel %vm109_vm3, %v116_v18, %v118_v24  ;;  %v123_v28 = vsel %vm109_vm3, %v120_v19, %v122_v25  ;;  %v131_v34 = vmul.u32 %v124_v10, %v115_v26  ;;  %323 = vrsqrt.f32 %v67_v61 }
  0x4e   :  { %v377_v29 = vmul.u32.u64.low %v124_v10, %v123_v28  ;;  %v378_v30 = vmul.u32.u64.high %v124_v10, %v123_v28, %v377_v29  ;;  %v380_v31 = vmul.u32.u64.low %v124_v10, %v119_v27  ;;  %v381_v32 = vmul.u32.u64.high %v124_v10, %v119_v27, %v380_v31 }
  0x4f   :  { %vm70_vm9 = vcmp.eq.f32.partialorder %v67_v61, inf  ;;  %vm72_vm10 = vcmp.eq.f32.partialorder %v67_v61, 0.0  ;;  %v73_v14 = vand.u32 2147483648, %v67_v61 }
  0x50   :  { %vm133_vm5 = vc.u32 %v378_v30, %v380_v31  ;;  %v134_v35 = vadd.s32 1, %v381_v32  ;;  %v132_v50 = vadd.s32 %v380_v31, %v378_v30 }
  0x52   :  { %v135_v37 = vsel %vm133_vm5, %v134_v35, %v381_v32 }
  0x53   :  { %v136_v38 = vadd.s32 %v135_v37, %v131_v34 }
  0x55   :  { %v137_v40 = vadd.s32 536870912, %v136_v38 }
  0x57   :  { %v138_v42 = vshrl.u32 %v137_v40, 30 }
  0x59   :  { %v139_v43 = vshll.u32 %v138_v42, 30  ;;  %v162_v2 = vsub.s32 4, %v138_v42 }
  0x5a   :  { %v324_v9 = vpop.eup %323 }
  0x5b   :  { %v140_v44 = vsub.s32 %v136_v38, %v139_v43  ;;  %v163_v5 = vsel %vm78_vm7, %v162_v2, %v138_v42  ;;  %v69_v12 = vmul.f32 %v324_v9, %v67_v61 }
  0x5c   :  { %v165_v7 = vsel %vm77_vm8, 0, %v163_v5 }
  0x5d   :  { %v142_v46 = vsub.s32 0, %v140_v44  ;;  %v274_v8 = vadd.s32 3, %v165_v7  ;;  %v169_v10 = vand.u32 3, %v165_v7  ;;  %v71_v15 = vsel %vm70_vm9, %v67_v61, %v69_v12 }
  0x5e   :  { %v74_v20 = vsel %vm72_vm10, %v73_v14, %v71_v15 }
  0x5f   :  { %v303_v47 = vmin.u32 %v142_v46, %v140_v44  ;;  %v275_v11 = vand.u32 3, %v274_v8  ;;  %vm174_vm11 = vcmp.eq.s32.totalorder %v169_v10, 2  ;;  %vm171_vm13 = vcmp.eq.s32.totalorder %v169_v10, 0 }
  0x60   :  { %vm170_vm15 = vcmp.lt.s32.totalorder %v169_v10, 2 }
  0x61   :  { %v144_v48 = vclz %v303_v47  ;;  %vm280_vm12 = vcmp.eq.s32.totalorder %v275_v11, 2  ;;  %vm277_vm14 = vcmp.eq.s32.totalorder %v275_v11, 0  ;;  %vm276_vm0 = vcmp.lt.s32.totalorder %v275_v11, 2 }
  0x63   :  { %v304_v49 = vadd.s32 4294967294, %v144_v48 }
  0x65   :  { %vm305_vm6 = vcmp.lt.s32.totalorder %v304_v49, 0 }
  0x66   :  { %v147_v52 = vsel %vm305_vm6, 0, %v304_v49 }
  0x67   :  { %v148_v53 = vsub.s32 32, %v147_v52  ;;  %v149_v54 = vshll.u32 %v140_v44, %v147_v52  ;;  %v152_v55 = vsub.s32 4294967266, %v147_v52 }
  0x69   :  { %v150_v57 = vshrl.u32 %v132_v50, %v148_v53  ;;  %v153_v58 = vadd.s32 127, %v152_v55 }
  0x6b   :  { %v151_v59 = vor.u32 %v150_v57, %v149_v54  ;;  %v154_v60 = vshll.u32 %v153_v58, 23 }
  0x6d   :  { %v155_v62 = vor.u32 4788187, %v154_v60  ;;  %v158_v63 = vcvt.s32.f32 %v151_v59 }
  0x6f   :  { %v156_v0 = vand.u32 2147483647, %v155_v62 }
  0x71   :  { %v159_v1 = vmul.f32 %v158_v63, %v156_v0 }
  0x73   :  { %v160_v3 = vxor.u32 2147483648, %v159_v1 }
  0x75   :  { %v161_v4 = vsel %vm78_vm7, %v160_v3, %v159_v1 }
  0x76   :  { %v164_v6 = vsel %vm77_vm8, %v371_v41, %v161_v4 }
  0x77   :  { %325 = vcosq.f32 %v164_v6 }
  0x78   :  { %327 = vsinq.f32 %v164_v6 }
  0x84   :  { %v326_v13 = vpop.eup %325 }
  0x85   :  { %v328_v45 = vpop.eup %327  ;;  %v175_v16 = vxor.u32 2147483648, %v326_v13 }
  0x86   :  { %v172_v17 = vxor.u32 2147483648, %v328_v45 }
  0x87   :  { %v176_v18 = vsel %vm174_vm11, %v175_v16, %v328_v45  ;;  %v282_v19 = vsel %vm280_vm12, %v175_v16, %v328_v45 }
  0x88   :  { %v173_v21 = vsel %vm171_vm13, %v326_v13, %v172_v17  ;;  %v279_v22 = vsel %vm277_vm14, %v326_v13, %v172_v17 }
  0x89   :  { %v177_v23 = vsel %vm170_vm15, %v173_v21, %v176_v18  ;;  %v283_v24 = vsel %vm276_vm0, %v279_v22, %v282_v19 }
  0x8a   :  { %v178_v25 = vsel %vm168_vm1, nan, %v177_v23  ;;  %v284_v26 = vsel %vm168_vm1, nan, %v283_v24 }
  0x8b   :  { %v179_v27 = vmul.f32 %v178_v25, %v74_v20  ;;  %v285_v28 = vmul.f32 %v284_v26, %v74_v20 }
  0x8d   :  { %180 = vst [vmem:[#allocation4] sm:$0xf] %v179_v27  ;;  %286 = vst [vmem:[#allocation4 + $0x4] sm:$0xf] %v285_v28 }
  0x8e   :  { %340 = shalt.err (!%p337_p4)
}
  0x8f   :  { %296 = dma.vmem_to_hbm [thread:$0]  %s294_s9, 128, %s396_s1, [#allocation5]  }
  0x90   :  { %349 = dma.done.wait [#allocation5], 128  }
  0x91   :  { %350 = vsyncadd [#allocation5], 4294967168 }
  0x92   :  { %300 = vsyncpa [#allocation5], 1 }

</bundles_post_ra>
